<compile_context>
chip_gen: v7x
topology: tpu7x:2x2x1
jax: 0.10.0
libtpu: 0.0.40
codegen_flags: <defaults>
</compile_context>

<pallas_src>
import math

import jax
import jax.numpy as jnp
from jax.experimental import pallas as pl
from jax.experimental.pallas import tpu as pltpu

D_IN = 100        # Generator latent dim
D_IN_PAD = 128    # contracting dim padded to lane width
D_H1 = 128
D_H2 = 256
LANE = 128
TM_MAX = 256      # batch tile cap (fills MXU rows on all generations)
TN_MAX = 2048     # N tile cap for the (256, xn*yn) output layer


def _cdiv(a, b):
    return -(-a // b)


def _round_up(x, m):
    return ((x + m - 1) // m) * m


def generator_kernel(z_ref, w1_ref, b1_ref, w2_ref, b2_ref, w3_ref, b3_ref,
                     out_ref):
    # Layers 1+2 are recomputed every grid step (cheap: 128x128 + 128x256
    # matmuls on a memory-bound kernel).  No cross-step state -> both grid
    # axes can be "parallel" and w3 stays resident across the inner M loop.
    h1 = jnp.dot(z_ref[...], w1_ref[...], preferred_element_type=jnp.float32)
    h1 = jnp.maximum(h1 + b1_ref[...], 0.0).astype(jnp.bfloat16)
    h2 = jnp.dot(h1, w2_ref[...], preferred_element_type=jnp.float32)
    h2 = jnp.maximum(h2 + b2_ref[...], 0.0).astype(jnp.bfloat16)
    out = jnp.dot(h2, w3_ref[...], preferred_element_type=jnp.float32)
    out_ref[...] = (out + b3_ref[...]).astype(out_ref.dtype)


def prepare_generator_params(params):
    """One-time weight prep: pad + cast to the kernel layout.

    Call once after init / weight update and reuse the result for every
    forward pass (keeps padding / casting traffic out of the hot path).
    """
    w1, b1, w2, b2, w3, b3 = params
    out_dim = w3.shape[1]

    # Balanced lane-dense N tiling.
    n_pad0 = _round_up(out_dim, LANE)
    grid_n = _cdiv(n_pad0, TN_MAX)
    tn = _round_up(_cdiv(n_pad0, grid_n), LANE)
    n_pad = grid_n * tn

    w1_p = jnp.zeros((D_IN_PAD, D_H1), jnp.bfloat16)
    w1_p = w1_p.at[:D_IN, :].set(w1.astype(jnp.bfloat16))
    w2_p = w2.astype(jnp.bfloat16)
    w3_p = jnp.zeros((D_H2, n_pad), jnp.bfloat16)
    w3_p = w3_p.at[:, :out_dim].set(w3.astype(jnp.bfloat16))

    b1_p = b1.astype(jnp.float32).reshape(1, D_H1)
    b2_p = b2.astype(jnp.float32).reshape(1, D_H2)
    b3_p = jnp.zeros((1, n_pad), jnp.float32)
    b3_p = b3_p.at[:, :out_dim].set(b3.astype(jnp.float32).reshape(1, -1))

    return {"w1": w1_p, "b1": b1_p, "w2": w2_p, "b2": b2_p,
            "w3": w3_p, "b3": b3_p, "out_dim": out_dim, "tn": tn}


def generator_forward(z, prep, out_dtype=jnp.float32):
    """Generator MLP forward pass as a single N/M-tiled Pallas TPU kernel."""
    B = z.shape[0]
    out_dim = prep["out_dim"]
    tn = prep["tn"]
    n_pad = prep["w3"].shape[1]
    grid_n = n_pad // tn

    # Balanced batch tiling: minimal padding, grid_m kept small so w3 is
    # re-fetched as rarely as possible (and not at all within a batch tile).
    grid_m = _cdiv(B, TM_MAX)
    tm = _round_up(_cdiv(B, grid_m), 16)   # 16-row multiple: bf16 sublane tile
    b_pad = grid_m * tm

    # Only per-call prep: cast z to bf16 and pad (K: 100 -> 128, M: B -> b_pad).
    z_bf = z.astype(jnp.bfloat16)
    if b_pad == B:
        z_p = jnp.pad(z_bf, ((0, 0), (0, D_IN_PAD - D_IN)))
    else:
        z_p = jnp.zeros((b_pad, D_IN_PAD), jnp.bfloat16)
        z_p = z_p.at[:B, :D_IN].set(z_bf)

    const = lambda shape: pl.BlockSpec(shape, lambda j, i: (0, 0))
    out_itemsize = jnp.dtype(out_dtype).itemsize
    cost = pl.CostEstimate(
        flops=2 * b_pad * (grid_n * (D_IN_PAD * D_H1 + D_H1 * D_H2)
                           + D_H2 * n_pad),
        transcendentals=0,
        bytes_accessed=(grid_n * b_pad * D_IN_PAD * 2        # z (per N tile)
                        + D_H2 * n_pad * 2 + n_pad * 4       # w3 + b3
                        + b_pad * n_pad * out_itemsize       # output
                        + (D_IN_PAD * D_H1 + D_H1 * D_H2) * 2
                        + (D_H1 + D_H2) * 4),
    )

    out_p = pl.pallas_call(
        generator_kernel,
        out_shape=jax.ShapeDtypeStruct((b_pad, n_pad), out_dtype),
        grid=(grid_n, grid_m),                                  # N outer, M inner
        in_specs=[
            pl.BlockSpec((tm, D_IN_PAD), lambda j, i: (i, 0)),  # z  (streams over M)
            const((D_IN_PAD, D_H1)),                            # w1 (VMEM-resident)
            const((1, D_H1)),                                   # b1
            const((D_H1, D_H2)),                                # w2
            const((1, D_H2)),                                   # b2
            pl.BlockSpec((D_H2, tn), lambda j, i: (0, j)),      # w3 (resident across inner M loop)
            pl.BlockSpec((1, tn), lambda j, i: (0, j)),         # b3
        ],
        out_specs=pl.BlockSpec((tm, tn), lambda j, i: (i, j)),
        compiler_params=pltpu.CompilerParams(
            dimension_semantics=("parallel", "parallel")),
        cost_estimate=cost,
    )(z_p, prep["w1"], prep["b1"], prep["w2"], prep["b2"],
      prep["w3"], prep["b3"])

    if b_pad == B and n_pad == out_dim:
        return out_p                       # no padding -> no slice pass
    return out_p[:B, :out_dim]


def init_generator_params(key, xn, yn):
    """PyTorch Linear default init: U(-1/sqrt(fan_in), 1/sqrt(fan_in)).

    Weights stored as (in, out) — the transpose of PyTorch's layout — so the
    kernel computes y = x @ W + b directly on the MXU.
    """
    dims = [(D_IN, D_H1), (D_H1, D_H2), (D_H2, xn * yn)]
    params = []
    for fan_in, fan_out in dims:
        key, kw, kb = jax.random.split(key, 3)
        bound = 1.0 / math.sqrt(fan_in)
        w = jax.random.uniform(kw, (fan_in, fan_out), jnp.float32, -bound, bound)
        b = jax.random.uniform(kb, (1, fan_out), jnp.float32, -bound, bound)
        params.extend([w, b])
    return tuple(params)


def generator_reference(z, params):
    """Pure-JAX reference mirroring the kernel's bf16-operand / f32-accum math.

    Note: bf16 operands are a deliberate design choice; results differ from a
    true f32 PyTorch Generator by more than typical 1e-5 tolerances.
    """
    w1, b1, w2, b2, w3, b3 = params
    bf16, f32 = jnp.bfloat16, jnp.float32
    h1 = jnp.maximum(
        jnp.dot(z.astype(bf16), w1.astype(bf16), preferred_element_type=f32) + b1, 0.0)
    h2 = jnp.maximum(
        jnp.dot(h1.astype(bf16), w2.astype(bf16), preferred_element_type=f32) + b2, 0.0)
    return jnp.dot(h2.astype(bf16), w3.astype(bf16), preferred_element_type=f32) + b3


if __name__ == "__main__":
    key = jax.random.PRNGKey(0)
    kz1, kz2, kz3, kp1, kp2 = jax.random.split(key, 5)

    # Case 1: small batch / small output (xn=yn=4 -> out_dim=16), grid (1, 1).
    xn, yn = 4, 4
    params = init_generator_params(kp1, xn, yn)
    prep = prepare_generator_params(params)       # one-time weight prep

    z_small = jax.random.normal(kz1, (8, D_IN), dtype=jnp.float32)
    out_small = jax.block_until_ready(generator_forward(z_small, prep))
    ref_small = generator_reference(z_small, params)
    assert out_small.shape == (8, xn * yn), out_small.shape
    assert jnp.allclose(out_small, ref_small, atol=1e-2, rtol=1e-2), "mismatch (small)"

    # Case 2: B=300 -> balanced batch tiling (grid_m=2, tm=160, pad 300->320).
    z_big = jax.random.normal(kz2, (300, D_IN), dtype=jnp.float32)
    out_big = jax.block_until_ready(generator_forward(z_big, prep))
    ref_big = generator_reference(z_big, params)
    assert out_big.shape == (300, xn * yn), out_big.shape
    assert jnp.allclose(out_big, ref_big, atol=1e-2, rtol=1e-2), "mismatch (tiled batch)"

    # Case 3: larger image (40x56=2240) -> two lane-dense N tiles (tn=1152),
    # exercising the N-streaming path with w3 resident across the M loop.
    xn2, yn2 = 40, 56
    params2 = init_generator_params(kp2, xn2, yn2)
    prep2 = prepare_generator_params(params2)
    z_mid = jax.random.normal(kz3, (32, D_IN), dtype=jnp.float32)
    out_mid = jax.block_until_ready(generator_forward(z_mid, prep2))
    ref_mid = generator_reference(z_mid, params2)
    assert out_mid.shape == (32, xn2 * yn2), out_mid.shape
    assert jnp.allclose(out_mid, ref_mid, atol=1e-2, rtol=1e-2), "mismatch (tiled N)"

    print("KERNEL_OK")
</pallas_src>

<mosaic_0001>
module attributes {stable_mosaic.version = 11 : i64} {
  func.func @generator_kernel(%arg0: i32, %arg1: i32, %arg2: memref<16x128xbf16, #tpu.memory_space<vmem>>, %arg3: memref<128x128xbf16, #tpu.memory_space<vmem>>, %arg4: memref<1x128xf32, #tpu.memory_space<vmem>>, %arg5: memref<128x256xbf16, #tpu.memory_space<vmem>>, %arg6: memref<1x256xf32, #tpu.memory_space<vmem>>, %arg7: memref<256x128xbf16, #tpu.memory_space<vmem>>, %arg8: memref<1x128xf32, #tpu.memory_space<vmem>>, %arg9: memref<16x128xf32, #tpu.memory_space<vmem>>) attributes {dimension_semantics = [#tpu.dimension_semantics<parallel>, #tpu.dimension_semantics<parallel>], iteration_bounds = array<i64: 1, 1>, scalar_prefetch = 0 : i64, scratch_operands = 0 : i64, tpu.core_type = #tpu.core_type<tc>, window_params = [{transform_indices = @transform_0, window_bounds = array<i64: 16, 128>}, {pipeline_mode = #tpu.pipeline_mode<synchronous>, transform_indices = @transform_1, window_bounds = array<i64: 128, 128>}, {pipeline_mode = #tpu.pipeline_mode<synchronous>, transform_indices = @transform_2, window_bounds = array<i64: 1, 128>}, {pipeline_mode = #tpu.pipeline_mode<synchronous>, transform_indices = @transform_3, window_bounds = array<i64: 128, 256>}, {pipeline_mode = #tpu.pipeline_mode<synchronous>, transform_indices = @transform_4, window_bounds = array<i64: 1, 256>}, {transform_indices = @transform_5, window_bounds = array<i64: 256, 128>}, {transform_indices = @transform_6, window_bounds = array<i64: 1, 128>}, {transform_indices = @transform_7, window_bounds = array<i64: 16, 128>}]} {
    %c0 = arith.constant 0 : index
    %c0_0 = arith.constant 0 : index
    %0 = vector.load %arg2[%c0, %c0_0] : memref<16x128xbf16, #tpu.memory_space<vmem>>, vector<16x128xbf16>
    %c0_1 = arith.constant 0 : index
    %c0_2 = arith.constant 0 : index
    %1 = vector.load %arg3[%c0_1, %c0_2] : memref<128x128xbf16, #tpu.memory_space<vmem>>, vector<128x128xbf16>
    %cst = arith.constant dense<0.000000e+00> : vector<16x128xf32>
    %2 = tpu.matmul %0, %1, %cst {dimension_numbers = #tpu.dot_dimension_numbers<[1], [0], [0], [1], [0, 0, 1, 1], [], []>} : vector<16x128xbf16>, vector<128x128xbf16>, vector<16x128xf32> -> vector<16x128xf32>
    %c0_3 = arith.constant 0 : index
    %c0_4 = arith.constant 0 : index
    %3 = vector.load %arg4[%c0_3, %c0_4] : memref<1x128xf32, #tpu.memory_space<vmem>>, vector<1x128xf32>
    %4 = vector.broadcast %3 : vector<1x128xf32> to vector<16x128xf32>
    %5 = arith.addf %2, %4 : vector<16x128xf32>
    %cst_5 = arith.constant 0.000000e+00 : f32
    %6 = vector.broadcast %cst_5 : f32 to vector<16x128xf32>
    %7 = arith.maximumf %5, %6 : vector<16x128xf32>
    %8 = arith.truncf %7 : vector<16x128xf32> to vector<16x128xbf16>
    %c0_6 = arith.constant 0 : index
    %c0_7 = arith.constant 0 : index
    %9 = vector.load %arg5[%c0_6, %c0_7] : memref<128x256xbf16, #tpu.memory_space<vmem>>, vector<128x256xbf16>
    %cst_8 = arith.constant dense<0.000000e+00> : vector<16x256xf32>
    %10 = tpu.matmul %8, %9, %cst_8 {dimension_numbers = #tpu.dot_dimension_numbers<[1], [0], [0], [1], [0, 0, 1, 1], [], []>} : vector<16x128xbf16>, vector<128x256xbf16>, vector<16x256xf32> -> vector<16x256xf32>
    %c0_9 = arith.constant 0 : index
    %c0_10 = arith.constant 0 : index
    %11 = vector.load %arg6[%c0_9, %c0_10] : memref<1x256xf32, #tpu.memory_space<vmem>>, vector<1x256xf32>
    %12 = vector.broadcast %11 : vector<1x256xf32> to vector<16x256xf32>
    %13 = arith.addf %10, %12 : vector<16x256xf32>
    %cst_11 = arith.constant 0.000000e+00 : f32
    %14 = vector.broadcast %cst_11 : f32 to vector<16x256xf32>
    %15 = arith.maximumf %13, %14 : vector<16x256xf32>
    %16 = arith.truncf %15 : vector<16x256xf32> to vector<16x256xbf16>
    %c0_12 = arith.constant 0 : index
    %c0_13 = arith.constant 0 : index
    %17 = vector.load %arg7[%c0_12, %c0_13] : memref<256x128xbf16, #tpu.memory_space<vmem>>, vector<256x128xbf16>
    %cst_14 = arith.constant dense<0.000000e+00> : vector<16x128xf32>
    %18 = tpu.matmul %16, %17, %cst_14 {dimension_numbers = #tpu.dot_dimension_numbers<[1], [0], [0], [1], [0, 0, 1, 1], [], []>} : vector<16x256xbf16>, vector<256x128xbf16>, vector<16x128xf32> -> vector<16x128xf32>
    %c0_15 = arith.constant 0 : index
    %c0_16 = arith.constant 0 : index
    %19 = vector.load %arg8[%c0_15, %c0_16] : memref<1x128xf32, #tpu.memory_space<vmem>>, vector<1x128xf32>
    %20 = vector.broadcast %19 : vector<1x128xf32> to vector<16x128xf32>
    %21 = arith.addf %18, %20 : vector<16x128xf32>
    %c0_17 = arith.constant 0 : index
    %c0_18 = arith.constant 0 : index
    %22 = vector.load %arg9[%c0_17, %c0_18] : memref<16x128xf32, #tpu.memory_space<vmem>>, vector<16x128xf32>
    tpu.vector_store %arg9[%c0_17, %c0_18], %21 {strides = array<i32>} : memref<16x128xf32, #tpu.memory_space<vmem>>, vector<16x128xf32>,
    return
  }
  func.func @transform_0(%arg0: i32, %arg1: i32) -> (i32, i32) {
    %c0_i32 = arith.constant 0 : i32
    %c0_i32_0 = arith.constant 0 : i32
    return %arg1, %c0_i32 : i32, i32
  }
  func.func @transform_1(%arg0: i32, %arg1: i32) -> (i32, i32) {
    %c0_i32 = arith.constant 0 : i32
    %c0_i32_0 = arith.constant 0 : i32
    %c0_i32_1 = arith.constant 0 : i32
    return %c0_i32, %c0_i32_0 : i32, i32
  }
  func.func @transform_2(%arg0: i32, %arg1: i32) -> (i32, i32) {
    %c0_i32 = arith.constant 0 : i32
    %c0_i32_0 = arith.constant 0 : i32
    %c0_i32_1 = arith.constant 0 : i32
    return %c0_i32, %c0_i32_0 : i32, i32
  }
  func.func @transform_3(%arg0: i32, %arg1: i32) -> (i32, i32) {
    %c0_i32 = arith.constant 0 : i32
    %c0_i32_0 = arith.constant 0 : i32
    %c0_i32_1 = arith.constant 0 : i32
    return %c0_i32, %c0_i32_0 : i32, i32
  }
  func.func @transform_4(%arg0: i32, %arg1: i32) -> (i32, i32) {
    %c0_i32 = arith.constant 0 : i32
    %c0_i32_0 = arith.constant 0 : i32
    %c0_i32_1 = arith.constant 0 : i32
    return %c0_i32, %c0_i32_0 : i32, i32
  }
  func.func @transform_5(%arg0: i32, %arg1: i32) -> (i32, i32) {
    %c0_i32 = arith.constant 0 : i32
    %c0_i32_0 = arith.constant 0 : i32
    return %c0_i32, %arg0 : i32, i32
  }
  func.func @transform_6(%arg0: i32, %arg1: i32) -> (i32, i32) {
    %c0_i32 = arith.constant 0 : i32
    %c0_i32_0 = arith.constant 0 : i32
    return %c0_i32, %arg0 : i32, i32
  }
  func.func @transform_7(%arg0: i32, %arg1: i32) -> (i32, i32) {
    %c0_i32 = arith.constant 0 : i32
    return %arg1, %arg0 : i32, i32
  }
}

</mosaic_0001>

<bundles_post_ra>
// kernel: tpu_custom_call.1
= control target key start
LH: loop header
LB: loop body
LE: loop exit
PB: predicated region body
PF: predicated region fallthrough
CT: control target
= control target key end

     0   :  { %12 = vsyncpa [#allocation3], 0  ;;  %s976_s0 = inlined_call_operand.hbm [shape: bf16[16,128], index: 0, kind: input, shape index: {}]   ;;  %s977_s1 = inlined_call_operand.hbm [shape: bf16[128,128], index: 1, kind: input, shape index: {}]   ;;  %s978_s2 = inlined_call_operand.vmem [shape: f32[1,128], index: 2, kind: input, shape index: {}]   ;;  %s979_s3 = inlined_call_operand.hbm [shape: bf16[128,256], index: 3, kind: input, shape index: {}]   ;;  %s980_s4 = inlined_call_operand.vmem [shape: f32[1,256], index: 4, kind: input, shape index: {}]   ;;  %s981_s5 = inlined_call_operand.hbm [shape: bf16[256,128], index: 5, kind: input, shape index: {}]   ;;  %s982_s6 = inlined_call_operand.vmem [shape: f32[1,128], index: 6, kind: input, shape index: {}]   ;;  %s983_s7 = inlined_call_operand.hbm [shape: f32[16,128], index: 7, kind: output, shape index: {}]  }
   0x1   :  { %13 = vsyncpa [#allocation6], 0 }
   0x2   :  { %14 = vsyncpa [#allocation9], 0 }
   0x3   :  { %15 = vsyncpa [#allocation4], 0  ;;  %s833_s24 = smov [#allocation5]   ;;  %s834_s26 = smov [#allocation2]  }
   0x4   :  { %s33_s25 = sshll.u32 %s833_s24, 4  ;;  %s21_s27 = sshll.u32 %s834_s26, 4  ;;  %s34_s25 = int_to_ptr.vmem [resolvable:$true] %s33_s25  ;;  %s885_s27 = int_to_ptr.vmem [resolvable:$true] %s21_s27 }
   0x5   :  { %s715_s30 = scalar_lea.hbm %s977_s1, 1024 }
   0x6   :  { %p716_p0 = scmp.ne.s32.totalorder %s977_s1, %s715_s30  ;;  %p719_p1 = scmp.lt.u32.totalorder %s715_s30, %s977_s1 }
   0x8   :  { %p721_p2 = pnand %p719_p1, %p716_p0 }
   0xa   :  { %724 = shalt.err (!%p721_p2)
}
   0xb   :  { %s725_s12 = scalar_lea.vmem %s34_s25, 1024  ;;  %p730_p4 = scmp.lt.s32.totalorder %s34_s25, %s34_s25 }
   0xc   :  { %p726_p3 = scmp.ne.s32.totalorder %s34_s25, %s725_s12  ;;  %p731_p5 = scmp.lt.s32.totalorder %s725_s12, %s725_s12 }
   0xe   :  { %p732_p6 = por %p731_p5, %p730_p4 }
  0x10   :  { %p733_p7 = pnand %p732_p6, %p726_p3 }
  0x12   :  { %736 = shalt.err (!%p733_p7)
}
  0x13   :  { %s835_s13 = smov 64   ;;  %s836_s14 = smov 4  }
  0x14   :  { %39 = dma.hbm_to_vmem [thread:$0]  %s977_s1, 1024, %s34_s25, [#allocation6], %s835_s13, %s835_s13, %s836_s14  }
  0x15   :  { %s737_s19 = scalar_lea.hbm %s976_s0, 128 }
  0x16   :  { %p738_p8 = scmp.ne.s32.totalorder %s976_s0, %s737_s19  ;;  %p741_p9 = scmp.lt.u32.totalorder %s737_s19, %s976_s0 }
  0x18   :  { %p743_p10 = pnand %p741_p9, %p738_p8 }
  0x1a   :  { %746 = shalt.err (!%p743_p10)
}
  0x1b   :  { %s747_s24 = scalar_lea.vmem %s885_s27, 128  ;;  %p752_p12 = scmp.lt.s32.totalorder %s885_s27, %s885_s27 }
  0x1c   :  { %p748_p11 = scmp.ne.s32.totalorder %s885_s27, %s747_s24  ;;  %p753_p13 = scmp.lt.s32.totalorder %s747_s24, %s747_s24 }
  0x1e   :  { %p754_p0 = por %p753_p13, %p752_p12 }
  0x20   :  { %p755_p1 = pnand %p754_p0, %p748_p11 }
  0x22   :  { %758 = shalt.err (!%p755_p1)
}
  0x23   :  { %27 = dma.hbm_to_vmem [thread:$0]  %s976_s0, 128, %s885_s27, [#allocation3], %s835_s13, %s835_s13, %s836_s14  }
  0x24   :  { %s837_s26 = smov [#allocation7]   ;;  %s759_s8 = scalar_lea.hbm %s979_s3, 2048 }
  0x25   :  { %s47_s28 = sshll.u32 %s837_s26, 4  ;;  %p760_p2 = scmp.ne.s32.totalorder %s979_s3, %s759_s8  ;;  %s48_s28 = int_to_ptr.vmem [resolvable:$true] %s47_s28 }
  0x26   :  { %p763_p3 = scmp.lt.u32.totalorder %s759_s8, %s979_s3 }
  0x28   :  { %p765_p4 = pnand %p763_p3, %p760_p2 }
  0x2a   :  { %768 = shalt.err (!%p765_p4)
}
  0x2b   :  { %s769_s15 = scalar_lea.vmem %s48_s28, 2048  ;;  %p774_p6 = scmp.lt.s32.totalorder %s48_s28, %s48_s28 }
  0x2c   :  { %p770_p5 = scmp.ne.s32.totalorder %s48_s28, %s769_s15  ;;  %p775_p7 = scmp.lt.s32.totalorder %s769_s15, %s769_s15 }
  0x2e   :  { %p776_p8 = por %p775_p7, %p774_p6 }
  0x30   :  { %p777_p9 = pnand %p776_p8, %p770_p5 }
  0x32   :  { %780 = shalt.err (!%p777_p9)
}
  0x33   :  { %s838_s0 = smov 128   ;;  %s839_s27 = smov 8  }
  0x34   :  { %53 = dma.hbm_to_vmem [thread:$0]  %s979_s3, 2048, %s48_s28, [#allocation6], %s838_s0, %s838_s0, %s839_s27  }
  0x35   :  { %s840_s18 = smov [#allocation8]   ;;  %s781_s22 = scalar_lea.hbm %s981_s5, 2048 }
  0x36   :  { %s61_s19 = sshll.u32 %s840_s18, 4  ;;  %p782_p10 = scmp.ne.s32.totalorder %s981_s5, %s781_s22  ;;  %s62_s19 = int_to_ptr.vmem [resolvable:$true] %s61_s19 }
  0x37   :  { %p785_p11 = scmp.lt.u32.totalorder %s781_s22, %s981_s5 }
  0x39   :  { %p787_p12 = pnand %p785_p11, %p782_p10 }
  0x3b   :  { %790 = shalt.err (!%p787_p12)
}
  0x3c   :  { %s791_s26 = scalar_lea.vmem %s62_s19, 2048  ;;  %p796_p0 = scmp.lt.s32.totalorder %s62_s19, %s62_s19 }
  0x3d   :  { %p792_p13 = scmp.ne.s32.totalorder %s62_s19, %s791_s26  ;;  %p797_p1 = scmp.lt.s32.totalorder %s791_s26, %s791_s26 }
  0x3f   :  { %p798_p2 = por %p797_p1, %p796_p0 }
  0x41   :  { %p799_p3 = pnand %p798_p2, %p792_p13 }
  0x43   :  { %802 = shalt.err (!%p799_p3)
}
  0x44   :  { %67 = dma.hbm_to_vmem [thread:$0]  %s981_s5, 2048, %s62_s19, [#allocation9], %s835_s13, %s835_s13, %s836_s14  }
  0x45   :  { %825 = dma.done.wait [#allocation3], 128  }
  0x46   :  { %826 = vsyncadd [#allocation3], 4294967168 }
  0x47   :  { %827 = dma.done.wait [#allocation6], 3072  }
  0x48   :  { %828 = vsyncadd [#allocation6], 4294964224 }
  0x49   :  { %829 = dma.done.wait [#allocation9], 2048  }
  0x4a   :  { %830 = vsyncadd [#allocation9], 4294965248  ;;  %v841_v0 = vmov 0.0   ;;  %vm842_vm0 = vmmov 0   ;;  %v666_v1 = vld [vmem:[#allocation5] sm:$0xff]   ;;  %v667_v2 = vld [vmem:[#allocation5 + $0x8] sm:$0xff]   ;;  %v224_v53 = vlaneseq }
  0x4b   :  { %634 = vmatprep.subr.bf16.mxu0 %v841_v0  ;;  %650 = vmatprep.mubr.msk.bf16.mxu0 %vm842_vm0, %v841_v0  ;;  %v668_v3 = vld [vmem:[#allocation5 + $0x10] sm:$0xff]   ;;  %v669_v4 = vld [vmem:[#allocation5 + $0x18] sm:$0xff]   ;;  %v675_v5 = vld [vmem:[#allocation7 + $0x4] ss:$8 sps:$4 sm:$0xff]   ;;  %v843_v26 = vmov 0   ;;  %s844_s30 = smov [#allocation10]  }
  0x4c   :  { %635 = vmatpush3.bf16.msra.mxu0 %v666_v1  ;;  %v677_v6 = vld [vmem:[#allocation7] ss:$8 sps:$4 sm:$0xff]   ;;  %314 = vmatprep.subr.bf16.mxu1 %v675_v5  ;;  %v678_v7 = vld [vmem:[#allocation7 + $0x14] ss:$8 sps:$4 sm:$0xff]   ;;  %v680_v8 = vld [vmem:[#allocation7 + $0x10] ss:$8 sps:$4 sm:$0xff]  }
  0x4d   :  { %636 = vmatprep.subr.bf16.mxu0 %v841_v0  ;;  %315 = vmatpush1.bf16.msra.mxu1 %v677_v6  ;;  %v681_v9 = vld [vmem:[#allocation7 + $0x24] ss:$8 sps:$4 sm:$0xff]   ;;  %v683_v12 = vld [vmem:[#allocation7 + $0x20] ss:$8 sps:$4 sm:$0xff]   ;;  %v684_v13 = vld [vmem:[#allocation7 + $0x34] ss:$8 sps:$4 sm:$0xff]  }
  0x4e   :  { %316 = vmatprep.subr.bf16.mxu1 %v678_v7  ;;  %v670_v10 = vld [vmem:[#allocation5 + $0x20] sm:$0xff]   ;;  %v671_v11 = vld [vmem:[#allocation5 + $0x28] sm:$0xff]   ;;  %v686_v14 = vld [vmem:[#allocation7 + $0x30] ss:$8 sps:$4 sm:$0xff]   ;;  %346 = vmatprep.mubr.bf16.mxu1 %v843_v26  ;;  %v225_v54 = vshrl.u32 %v224_v53, 7  ;;  %s546_s8 = sshll.u32 %s844_s30, 4  ;;  %s547_s8 = int_to_ptr.vmem [resolvable:$true] %s546_s8 }
  0x4f   :  { %v687_v15 = vld [vmem:[#allocation7 + $0x44] ss:$8 sps:$4 sm:$0xff]   ;;  %v672_v16 = vld [vmem:[#allocation5 + $0x30] sm:$0xff]   ;;  %v689_v17 = vld [vmem:[#allocation7 + $0x40] ss:$8 sps:$4 sm:$0xff]   ;;  %s803_s9 = scalar_lea.vmem %s547_s8, 256  ;;  %p808_p5 = scmp.lt.s32.totalorder %s547_s8, %s547_s8 }
  0x50   :  { %637 = vmatpush3.bf16.msra.mxu0 %v667_v2  ;;  %v690_v18 = vld [vmem:[#allocation7 + $0x54] ss:$8 sps:$4 sm:$0xff]   ;;  %v692_v20 = vld [vmem:[#allocation7 + $0x50] ss:$8 sps:$4 sm:$0xff]   ;;  %v693_v22 = vld [vmem:[#allocation7 + $0x64] ss:$8 sps:$4 sm:$0xff]   ;;  %p804_p4 = scmp.ne.s32.totalorder %s547_s8, %s803_s9  ;;  %p809_p6 = scmp.lt.s32.totalorder %s803_s9, %s803_s9 }
  0x51   :  { %638 = vmatprep.subr.bf16.mxu0 %v841_v0  ;;  %317 = vmatpush1.bf16.msra.mxu1 %v680_v8  ;;  %v673_v19 = vld [vmem:[#allocation5 + $0x38] sm:$0xff]   ;;  %v695_v23 = vld [vmem:[#allocation7 + $0x60] ss:$8 sps:$4 sm:$0xff]   ;;  %v703_v31 = vld [vmem:[#allocation8 + $0x50] sm:$0xff]   ;;  %v226_v55 = vsub.s32 0, %v225_v54  ;;  %v230_v57 = vsub.s32 1, %v225_v54 }
  0x52   :  { %318 = vmatprep.subr.bf16.mxu1 %v681_v9  ;;  %v674_v21 = vld [vmem:[#allocation2] sm:$0xff]   ;;  %v699_v27 = vld [vmem:[#allocation8 + $0x40] sm:$0xff]   ;;  %v701_v29 = vld [vmem:[#allocation8 + $0x48] sm:$0xff]   ;;  %p810_p7 = por %p809_p6, %p808_p5 }
  0x53   :  { %v696_v24 = vld [vmem:[#allocation7 + $0x74] ss:$8 sps:$4 sm:$0xff]   ;;  %v698_v25 = vld [vmem:[#allocation7 + $0x70] ss:$8 sps:$4 sm:$0xff]   ;;  %v700_v28 = vld [vmem:[#allocation8] sm:$0xff]  }
  0x54   :  { %639 = vmatpush3.bf16.msra.mxu0 %v668_v3  ;;  %v702_v30 = vld [vmem:[#allocation8 + $0x8] sm:$0xff]   ;;  %v704_v32 = vld [vmem:[#allocation8 + $0x10] sm:$0xff]   ;;  %v705_v33 = vld [vmem:[#allocation8 + $0x58] sm:$0xff]   ;;  %p811_p8 = pnand %p810_p7, %p804_p4 }
  0x55   :  { %640 = vmatprep.subr.bf16.mxu0 %v841_v0  ;;  %319 = vmatpush1.bf16.msra.mxu1 %v683_v12  ;;  %v706_v34 = vld [vmem:[#allocation8 + $0x18] sm:$0xff]   ;;  %v707_v35 = vld [vmem:[#allocation8 + $0x60] sm:$0xff]   ;;  %v709_v37 = vld [vmem:[#allocation8 + $0x68] sm:$0xff]  }
  0x56   :  { %320 = vmatprep.subr.bf16.mxu1 %v684_v13  ;;  %v708_v36 = vld [vmem:[#allocation8 + $0x20] sm:$0xff]   ;;  %v560_v38 = vld [vmem:[%s978_s2] ss:$0 sm:$0xff]  ;;  %v710_v48 = vld [vmem:[#allocation8 + $0x28] sm:$0xff]  }
  0x57   :  { %v711_v49 = vld [vmem:[#allocation8 + $0x70] sm:$0xff]   ;;  %v713_v51 = vld [vmem:[#allocation8 + $0x78] sm:$0xff]  }
  0x58   :  { %641 = vmatpush3.bf16.msra.mxu0 %v669_v4  ;;  %v712_v50 = vld [vmem:[#allocation8 + $0x30] sm:$0xff]   ;;  %v714_v52 = vld [vmem:[#allocation8 + $0x38] sm:$0xff]  }
  0x59   :  { %642 = vmatprep.subr.bf16.mxu0 %v841_v0  ;;  %321 = vmatpush1.bf16.msra.mxu1 %v686_v14  ;;  %v222_v56 = vld [vmem:[%s980_s4] sm:$0x3] }
  0x5a   :  { %322 = vmatprep.subr.bf16.mxu1 %v687_v15  ;;  %v227_v58 = vrot.slane %v222_v56, %v226_v55  ;;  %v231_v59 = vrot.slane %v222_v56, %v230_v57 }
  0x5c   :  { %643 = vmatpush3.bf16.msra.mxu0 %v670_v10 }
  0x5d   :  { %644 = vmatprep.subr.bf16.mxu0 %v841_v0  ;;  %323 = vmatpush1.bf16.msra.mxu1 %v689_v17 }
  0x5e   :  { %324 = vmatprep.subr.bf16.mxu1 %v690_v18 }
  0x60   :  { %645 = vmatpush3.bf16.msra.mxu0 %v671_v11  ;;  %v586_v11 = vld [vmem:[%s982_s6] ss:$0 sm:$0xff] }
  0x61   :  { %646 = vmatprep.subr.bf16.mxu0 %v841_v0  ;;  %325 = vmatpush1.bf16.msra.mxu1 %v692_v20 }
  0x62   :  { %326 = vmatprep.subr.bf16.mxu1 %v693_v22 }
  0x64   :  { %647 = vmatpush3.bf16.msra.mxu0 %v672_v16 }
  0x65   :  { %648 = vmatprep.subr.bf16.mxu0 %v841_v0  ;;  %327 = vmatpush1.bf16.msra.mxu1 %v695_v23 }
  0x66   :  { %328 = vmatprep.subr.bf16.mxu1 %v696_v24 }
  0x68   :  { %649 = vmatpush3.bf16.msra.mxu0 %v673_v19 }
  0x69   :  { %329 = vmatpush1.bf16.msra.mxu1 %v698_v25  ;;  %612 = vmatprep.subr.bf16.mxu0 %v699_v27 }
  0x6b   :  { %651 = vmatmul.mubr.bf16.vlgmr.msra.gmra.mrb[0].mxu0 %v674_v21 }
  0x6c   :  { %613 = vmatpush3.bf16.msra.mxu0 %v700_v28 }
  0x6d   :  { %614 = vmatprep.subr.bf16.mxu0 %v701_v29 }
  0x70   :  { %615 = vmatpush3.bf16.msra.mxu0 %v702_v30 }
  0x71   :  { %616 = vmatprep.subr.bf16.mxu0 %v703_v31 }
  0x74   :  { %617 = vmatpush3.bf16.msra.mxu0 %v704_v32 }
  0x75   :  { %618 = vmatprep.subr.bf16.mxu0 %v705_v33 }
  0x78   :  { %619 = vmatpush3.bf16.msra.mxu0 %v706_v34 }
  0x79   :  { %620 = vmatprep.subr.bf16.mxu0 %v707_v35 }
  0x7c   :  { %621 = vmatpush3.bf16.msra.mxu0 %v708_v36 }
  0x7d   :  { %622 = vmatprep.subr.bf16.mxu0 %v709_v37 }
  0x80   :  { %623 = vmatpush3.bf16.msra.mxu0 %v710_v48 }
  0x81   :  { %624 = vmatprep.subr.bf16.mxu0 %v711_v49 }
  0x84   :  { %625 = vmatpush3.bf16.msra.mxu0 %v712_v50 }
  0x85   :  { %626 = vmatprep.subr.bf16.mxu0 %v713_v51 }
  0x88   :  { %627 = vmatpush3.bf16.msra.mxu0 %v714_v52 }
 0x13e   :  { %v196_v39 = vpop.f32.mrb[0].mxu0 }
 0x13f   :  { %v197_v40 = vadd.f32 %v560_v38, %v196_v39  ;;  %v652_v41 = vpop.f32.mrb[1].mxu0 }
 0x140   :  { %v199_v42 = vpop.f32.mrb[2].mxu0 }
 0x141   :  { %v200_v43 = vadd.f32 %v560_v38, %v199_v42  ;;  %v653_v44 = vpop.f32.mrb[3].mxu0  ;;  %v203_v45 = vmax.f32 %v197_v40, 0.0 }
 0x143   :  { %v204_v46 = vmax.f32 %v200_v43, 0.0 }
 0x145   :  { %v205_v47 = vpack.c.bf16 %v204_v46, %v203_v45 }
 0x147   :  { %347 = vmatmul.mubr.bf16.vlgmr.msra.gmra.mrb[0].mxu1 %v205_v47 }
 0x21a   :  { %v348_v60 = vpop.f32.mrb[0].mxu1 }
 0x21b   :  { %v349_v61 = vadd.f32 %v348_v60, %v227_v58  ;;  %v350_v62 = vpop.f32.mrb[1].mxu1 }
 0x21c   :  { %v351_v63 = vadd.f32 %v350_v62, %v231_v59  ;;  %v352_v0 = vpop.f32.mrb[2].mxu1 }
 0x21d   :  { %v353_v1 = vadd.f32 %v352_v0, %v227_v58  ;;  %v354_v2 = vpop.f32.mrb[3].mxu1  ;;  %v357_v4 = vmax.f32 %v349_v61, 0.0 }
 0x21e   :  { %v355_v3 = vadd.f32 %v354_v2, %v231_v59  ;;  %v358_v6 = vmax.f32 %v351_v63, 0.0 }
 0x21f   :  { %v359_v5 = vmax.f32 %v353_v1, 0.0 }
 0x220   :  { %v360_v7 = vmax.f32 %v355_v3, 0.0 }
 0x221   :  { %v361_v8 = vpack.c.bf16 %v359_v5, %v357_v4 }
 0x222   :  { %v362_v9 = vpack.c.bf16 %v360_v7, %v358_v6 }
 0x224   :  { %530 = vmatprep.mubr.bf16.mxu0 %v362_v9 }
 0x225   :  { %531 = vmatmul.mubr.bf16.vlgmr.msra.gmra.mrb[4].mxu0 %v361_v8 }
 0x2f8   :  { %v628_v10 = vpop.f32.mrb[4].mxu0 }
 0x2f9   :  { %v629_v12 = vpop.f32.mrb[5].mxu0 }
 0x2fa   :  { %v630_v13 = vadd.f32 %v629_v12, %v628_v10  ;;  %v631_v14 = vpop.f32.mrb[6].mxu0 }
 0x2fb   :  { %v632_v15 = vpop.f32.mrb[7].mxu0 }
 0x2fc   :  { %v533_v16 = vadd.f32 %v630_v13, %v586_v11  ;;  %v633_v17 = vadd.f32 %v632_v15, %v631_v14 }
 0x2fe   :  { %539 = vst [vmem:[#allocation10] sm:$0xff] %v533_v16  ;;  %v536_v18 = vadd.f32 %v633_v17, %v586_v11 }
 0x300   :  { %540 = vst [vmem:[#allocation10 + $0x8] sm:$0xff] %v536_v18 }
 0x301   :  { %814 = shalt.err (!%p811_p8)
}
 0x302   :  { %s815_s11 = scalar_lea.hbm %s983_s7, 256 }
 0x303   :  { %p816_p9 = scmp.ne.s32.totalorder %s983_s7, %s815_s11  ;;  %p819_p10 = scmp.lt.u32.totalorder %s815_s11, %s983_s7 }
 0x305   :  { %p821_p11 = pnand %p819_p10, %p816_p9 }
 0x307   :  { %824 = shalt.err (!%p821_p11)
}
 0x308   :  { %552 = dma.vmem_to_hbm [thread:$0]  %s547_s8, 256, %s983_s7, [#allocation4], %s838_s0, %s838_s0, %s839_s27  }
 0x309   :  { %831 = dma.done.wait [#allocation4], 256  }
 0x30a   :  { %832 = vsyncadd [#allocation4], 4294967040 }
 0x30b   :  { %556 = vsyncpa [#allocation3], 1 }
 0x30c   :  { %557 = vsyncpa [#allocation6], 1 }
 0x30d   :  { %558 = vsyncpa [#allocation9], 1 }
 0x30e   :  { %559 = vsyncpa [#allocation4], 1 }

</bundles_post_ra>
